<compile_context>
chip_gen: v6e
topology: v6e:2x2x1
jax: 0.10.0
libtpu: 0.0.40
codegen_flags: <defaults>
</compile_context>

<pallas_src>
import functools

import jax
import jax.numpy as jnp
from jax.experimental import pallas as pl
from jax.experimental.pallas import tpu as pltpu

H1, H2 = 400, 300            # true hidden dims of the PyTorch Actor
H1_PAD, H2_PAD = 512, 384    # lane-aligned (multiples of 128)
LANE = 128
SUBLANE = 8


def _round_up(n, m):
    return ((n + m - 1) // m) * m


def _actor_kernel(x_ref, w1_ref, b1_ref, w2_ref, b2_ref, w3_ref, b3_ref,
                  o_ref, *, max_action):
    # layer 1: (TB, S_pad) @ (S_pad, 512) -> +bias -> relu   (f32 accumulate)
    h1 = jnp.dot(x_ref[...].astype(jnp.bfloat16), w1_ref[...],
                 preferred_element_type=jnp.float32)
    h1 = jnp.maximum(h1 + b1_ref[...], 0.0)
    # layer 2: (TB, 512) @ (512, 384) -> +bias -> relu
    h2 = jnp.dot(h1.astype(jnp.bfloat16), w2_ref[...],
                 preferred_element_type=jnp.float32)
    h2 = jnp.maximum(h2 + b2_ref[...], 0.0)
    # layer 3: (TB, 384) @ (384, A_pad) -> +bias -> max_action * tanh
    h3 = jnp.dot(h2.astype(jnp.bfloat16), w3_ref[...],
                 preferred_element_type=jnp.float32)
    o_ref[...] = (max_action * jnp.tanh(h3 + b3_ref[...])).astype(o_ref.dtype)


def init_actor_params(key, state_dim, action_dim):
    """PyTorch-Linear-style uniform init. Weights stored transposed as
    (in_features, out_features) float32, biases as (1, out_features)."""
    dims = [(state_dim, H1), (H1, H2), (H2, action_dim)]
    params = []
    for fan_in, fan_out in dims:
        key, kw, kb = jax.random.split(key, 3)
        bound = 1.0 / jnp.sqrt(float(fan_in))
        w = jax.random.uniform(kw, (fan_in, fan_out), jnp.float32,
                               minval=-bound, maxval=bound)
        b = jax.random.uniform(kb, (1, fan_out), jnp.float32,
                               minval=-bound, maxval=bound)
        params.extend([w, b])
    return tuple(params)


def prepare_actor_params(params, state_dim, action_dim):
    """Pad to lane-aligned shapes once (amortized across calls) and cast the
    weights to bf16. Zero padding keeps results numerically identical (up to
    the bf16 weight cast)."""
    w1, b1, w2, b2, w3, b3 = params
    s_pad = _round_up(state_dim, LANE)
    a_pad = _round_up(action_dim, LANE)

    def pad_w(w, rows, cols):
        return jnp.pad(w, ((0, rows - w.shape[0]),
                           (0, cols - w.shape[1]))).astype(jnp.bfloat16)

    def pad_b(b, cols):
        return jnp.pad(b, ((0, 0), (0, cols - b.shape[1]))).astype(jnp.float32)

    return (pad_w(w1, s_pad, H1_PAD), pad_b(b1, H1_PAD),
            pad_w(w2, H1_PAD, H2_PAD), pad_b(b2, H2_PAD),
            pad_w(w3, H2_PAD, a_pad), pad_b(b3, a_pad))


def actor_forward(x, padded_params, max_action, *, action_dim, block_b=256):
    """Pallas forward. x: (batch, state_dim) float32. padded_params from
    prepare_actor_params (kept resident/reused across calls)."""
    w1, b1, w2, b2, w3, b3 = padded_params
    batch, state_dim = x.shape
    s_pad = w1.shape[0]
    a_pad = w3.shape[1]

    # batch tile: multiple of 8 sublanes, capped at block_b
    tb = min(block_b, _round_up(batch, SUBLANE))
    b_pad = _round_up(batch, tb)

    x_p = x.astype(jnp.float32)
    if (b_pad, s_pad) != (batch, state_dim):
        x_p = jnp.pad(x_p, ((0, b_pad - batch), (0, s_pad - state_dim)))

    const = lambda i: (0, 0)          # weights/biases: same block every step
    tile = lambda i: (i, 0)           # x / out: tiled along batch

    out = pl.pallas_call(
        functools.partial(_actor_kernel, max_action=float(max_action)),
        out_shape=jax.ShapeDtypeStruct((b_pad, a_pad), jnp.float32),
        grid=(b_pad // tb,),
        in_specs=[
            pl.BlockSpec((tb, s_pad), tile),
            pl.BlockSpec((s_pad, H1_PAD), const),
            pl.BlockSpec((1, H1_PAD), const),
            pl.BlockSpec((H1_PAD, H2_PAD), const),
            pl.BlockSpec((1, H2_PAD), const),
            pl.BlockSpec((H2_PAD, a_pad), const),
            pl.BlockSpec((1, a_pad), const),
        ],
        out_specs=pl.BlockSpec((tb, a_pad), tile),
        compiler_params=pltpu.CompilerParams(
            dimension_semantics=("parallel",)),
    )(x_p, w1, b1, w2, b2, w3, b3)

    return out[:batch, :action_dim]


def actor_forward_ref(x, params, max_action):
    """Plain-JAX f32 reference for correctness check."""
    w1, b1, w2, b2, w3, b3 = params
    h = jax.nn.relu(x @ w1 + b1)
    h = jax.nn.relu(h @ w2 + b2)
    return max_action * jnp.tanh(h @ w3 + b3)


if __name__ == "__main__":
    state_dim = 8
    action_dim = 4
    max_action = 2.0
    batch = 2

    key = jax.random.PRNGKey(0)
    key, kx = jax.random.split(key)
    x = jax.random.normal(kx, (batch, state_dim), jnp.float32)

    params = init_actor_params(key, state_dim, action_dim)
    padded_params = prepare_actor_params(params, state_dim, action_dim)

    out = actor_forward(x, padded_params, max_action, action_dim=action_dim)
    out = jax.block_until_ready(out)

    ref = actor_forward_ref(x, params, max_action)
    assert out.shape == (batch, action_dim)
    # bf16 weights -> looser tolerance than full f32
    assert jnp.allclose(out, ref, atol=3e-2, rtol=3e-2), "mismatch vs reference"

    print("KERNEL_OK")
</pallas_src>

<mosaic_0001>
module attributes {stable_mosaic.version = 11 : i64} {
  func.func @_actor_kernel(%arg0: i32, %arg1: memref<8x128xf32, #tpu.memory_space<vmem>>, %arg2: memref<128x512xbf16, #tpu.memory_space<vmem>>, %arg3: memref<1x512xf32, #tpu.memory_space<vmem>>, %arg4: memref<512x384xbf16, #tpu.memory_space<vmem>>, %arg5: memref<1x384xf32, #tpu.memory_space<vmem>>, %arg6: memref<384x128xbf16, #tpu.memory_space<vmem>>, %arg7: memref<1x128xf32, #tpu.memory_space<vmem>>, %arg8: memref<8x128xf32, #tpu.memory_space<vmem>>) attributes {dimension_semantics = [#tpu.dimension_semantics<parallel>], iteration_bounds = array<i64: 1>, scalar_prefetch = 0 : i64, scratch_operands = 0 : i64, tpu.core_type = #tpu.core_type<tc>, window_params = [{transform_indices = @transform_0, window_bounds = array<i64: 8, 128>}, {pipeline_mode = #tpu.pipeline_mode<synchronous>, transform_indices = @transform_1, window_bounds = array<i64: 128, 512>}, {pipeline_mode = #tpu.pipeline_mode<synchronous>, transform_indices = @transform_2, window_bounds = array<i64: 1, 512>}, {pipeline_mode = #tpu.pipeline_mode<synchronous>, transform_indices = @transform_3, window_bounds = array<i64: 512, 384>}, {pipeline_mode = #tpu.pipeline_mode<synchronous>, transform_indices = @transform_4, window_bounds = array<i64: 1, 384>}, {pipeline_mode = #tpu.pipeline_mode<synchronous>, transform_indices = @transform_5, window_bounds = array<i64: 384, 128>}, {pipeline_mode = #tpu.pipeline_mode<synchronous>, transform_indices = @transform_6, window_bounds = array<i64: 1, 128>}, {transform_indices = @transform_7, window_bounds = array<i64: 8, 128>}]} {
    %c0 = arith.constant 0 : index
    %c0_0 = arith.constant 0 : index
    %0 = vector.load %arg1[%c0, %c0_0] : memref<8x128xf32, #tpu.memory_space<vmem>>, vector<8x128xf32>
    %1 = arith.truncf %0 : vector<8x128xf32> to vector<8x128xbf16>
    %c0_1 = arith.constant 0 : index
    %c0_2 = arith.constant 0 : index
    %2 = vector.load %arg2[%c0_1, %c0_2] : memref<128x512xbf16, #tpu.memory_space<vmem>>, vector<128x512xbf16>
    %cst = arith.constant dense<0.000000e+00> : vector<8x512xf32>
    %3 = tpu.matmul %1, %2, %cst {dimension_numbers = #tpu.dot_dimension_numbers<[1], [0], [0], [1], [0, 0, 1, 1], [], []>} : vector<8x128xbf16>, vector<128x512xbf16>, vector<8x512xf32> -> vector<8x512xf32>
    %c0_3 = arith.constant 0 : index
    %c0_4 = arith.constant 0 : index
    %4 = vector.load %arg3[%c0_3, %c0_4] : memref<1x512xf32, #tpu.memory_space<vmem>>, vector<1x512xf32>
    %5 = vector.broadcast %4 : vector<1x512xf32> to vector<8x512xf32>
    %6 = arith.addf %3, %5 : vector<8x512xf32>
    %cst_5 = arith.constant 0.000000e+00 : f32
    %7 = vector.broadcast %cst_5 : f32 to vector<8x512xf32>
    %8 = arith.maximumf %6, %7 : vector<8x512xf32>
    %9 = arith.truncf %8 : vector<8x512xf32> to vector<8x512xbf16>
    %c0_6 = arith.constant 0 : index
    %c0_7 = arith.constant 0 : index
    %10 = vector.load %arg4[%c0_6, %c0_7] : memref<512x384xbf16, #tpu.memory_space<vmem>>, vector<512x384xbf16>
    %cst_8 = arith.constant dense<0.000000e+00> : vector<8x384xf32>
    %11 = tpu.matmul %9, %10, %cst_8 {dimension_numbers = #tpu.dot_dimension_numbers<[1], [0], [0], [1], [0, 0, 1, 1], [], []>} : vector<8x512xbf16>, vector<512x384xbf16>, vector<8x384xf32> -> vector<8x384xf32>
    %c0_9 = arith.constant 0 : index
    %c0_10 = arith.constant 0 : index
    %12 = vector.load %arg5[%c0_9, %c0_10] : memref<1x384xf32, #tpu.memory_space<vmem>>, vector<1x384xf32>
    %13 = vector.broadcast %12 : vector<1x384xf32> to vector<8x384xf32>
    %14 = arith.addf %11, %13 : vector<8x384xf32>
    %cst_11 = arith.constant 0.000000e+00 : f32
    %15 = vector.broadcast %cst_11 : f32 to vector<8x384xf32>
    %16 = arith.maximumf %14, %15 : vector<8x384xf32>
    %17 = arith.truncf %16 : vector<8x384xf32> to vector<8x384xbf16>
    %c0_12 = arith.constant 0 : index
    %c0_13 = arith.constant 0 : index
    %18 = vector.load %arg6[%c0_12, %c0_13] : memref<384x128xbf16, #tpu.memory_space<vmem>>, vector<384x128xbf16>
    %cst_14 = arith.constant dense<0.000000e+00> : vector<8x128xf32>
    %19 = tpu.matmul %17, %18, %cst_14 {dimension_numbers = #tpu.dot_dimension_numbers<[1], [0], [0], [1], [0, 0, 1, 1], [], []>} : vector<8x384xbf16>, vector<384x128xbf16>, vector<8x128xf32> -> vector<8x128xf32>
    %c0_15 = arith.constant 0 : index
    %c0_16 = arith.constant 0 : index
    %20 = vector.load %arg7[%c0_15, %c0_16] : memref<1x128xf32, #tpu.memory_space<vmem>>, vector<1x128xf32>
    %21 = vector.broadcast %20 : vector<1x128xf32> to vector<8x128xf32>
    %22 = arith.addf %19, %21 : vector<8x128xf32>
    %23 = math.tanh %22 : vector<8x128xf32>
    %cst_17 = arith.constant 2.000000e+00 : f32
    %24 = vector.broadcast %cst_17 : f32 to vector<8x128xf32>
    %25 = arith.mulf %24, %23 : vector<8x128xf32>
    %c0_18 = arith.constant 0 : index
    %c0_19 = arith.constant 0 : index
    %26 = vector.load %arg8[%c0_18, %c0_19] : memref<8x128xf32, #tpu.memory_space<vmem>>, vector<8x128xf32>
    tpu.vector_store %arg8[%c0_18, %c0_19], %25 {strides = array<i32>} : memref<8x128xf32, #tpu.memory_space<vmem>>, vector<8x128xf32>,
    return
  }
  func.func @transform_0(%arg0: i32) -> (i32, i32) {
    %c0_i32 = arith.constant 0 : i32
    %c0_i32_0 = arith.constant 0 : i32
    return %arg0, %c0_i32 : i32, i32
  }
  func.func @transform_1(%arg0: i32) -> (i32, i32) {
    %c0_i32 = arith.constant 0 : i32
    %c0_i32_0 = arith.constant 0 : i32
    %c0_i32_1 = arith.constant 0 : i32
    return %c0_i32, %c0_i32_0 : i32, i32
  }
  func.func @transform_2(%arg0: i32) -> (i32, i32) {
    %c0_i32 = arith.constant 0 : i32
    %c0_i32_0 = arith.constant 0 : i32
    %c0_i32_1 = arith.constant 0 : i32
    return %c0_i32, %c0_i32_0 : i32, i32
  }
  func.func @transform_3(%arg0: i32) -> (i32, i32) {
    %c0_i32 = arith.constant 0 : i32
    %c0_i32_0 = arith.constant 0 : i32
    %c0_i32_1 = arith.constant 0 : i32
    return %c0_i32, %c0_i32_0 : i32, i32
  }
  func.func @transform_4(%arg0: i32) -> (i32, i32) {
    %c0_i32 = arith.constant 0 : i32
    %c0_i32_0 = arith.constant 0 : i32
    %c0_i32_1 = arith.constant 0 : i32
    return %c0_i32, %c0_i32_0 : i32, i32
  }
  func.func @transform_5(%arg0: i32) -> (i32, i32) {
    %c0_i32 = arith.constant 0 : i32
    %c0_i32_0 = arith.constant 0 : i32
    %c0_i32_1 = arith.constant 0 : i32
    return %c0_i32, %c0_i32_0 : i32, i32
  }
  func.func @transform_6(%arg0: i32) -> (i32, i32) {
    %c0_i32 = arith.constant 0 : i32
    %c0_i32_0 = arith.constant 0 : i32
    %c0_i32_1 = arith.constant 0 : i32
    return %c0_i32, %c0_i32_0 : i32, i32
  }
  func.func @transform_7(%arg0: i32) -> (i32, i32) {
    %c0_i32 = arith.constant 0 : i32
    %c0_i32_0 = arith.constant 0 : i32
    return %arg0, %c0_i32 : i32, i32
  }
}

</mosaic_0001>

<bundles_post_ra>
// kernel: tpu_custom_call.1
= control target key start
LH: loop header
LB: loop body
LE: loop exit
PB: predicated region body
PF: predicated region fallthrough
CT: control target
= control target key end

     0   :  { %12 = vsyncpa [#allocation3], 0  ;;  %s2220_s0 = inlined_call_operand.hbm [shape: f32[8,128], index: 0, kind: input, shape index: {}]   ;;  %s2221_s1 = inlined_call_operand.hbm [shape: bf16[128,512], index: 1, kind: input, shape index: {}]   ;;  %s2222_s2 = inlined_call_operand.hbm [shape: f32[1,512], index: 2, kind: input, shape index: {}]   ;;  %s2223_s3 = inlined_call_operand.hbm [shape: bf16[512,384], index: 3, kind: input, shape index: {}]   ;;  %s2224_s4 = inlined_call_operand.vmem [shape: f32[1,384], index: 4, kind: input, shape index: {}]   ;;  %s2225_s5 = inlined_call_operand.hbm [shape: bf16[384,128], index: 5, kind: input, shape index: {}]   ;;  %s2226_s6 = inlined_call_operand.vmem [shape: f32[1,128], index: 6, kind: input, shape index: {}]   ;;  %s2227_s7 = inlined_call_operand.hbm [shape: f32[8,128], index: 7, kind: output, shape index: {}]  }
   0x1   :  { %13 = vsyncpa [#allocation6], 0 }
   0x2   :  { %14 = vsyncpa [#allocation9], 0 }
   0x3   :  { %15 = vsyncpa [#allocation4], 0  ;;  %s2115_s24 = smov [#allocation5]  }
   0x4   :  { %s31_s25 = sshll.u32 %s2115_s24, 4  ;;  %s32_s25 = int_to_ptr.vmem [resolvable:$true] %s31_s25 }
   0x5   :  { %s1995_s26 = scalar_lea.vmem %s32_s25, 4096  ;;  %p2000_p1 = scmp.lt.s32.totalorder %s32_s25, %s32_s25 }
   0x6   :  { %p1996_p0 = scmp.ne.s32.totalorder %s32_s25, %s1995_s26  ;;  %p2001_p2 = scmp.lt.s32.totalorder %s1995_s26, %s1995_s26 }
   0x8   :  { %p2002_p3 = por %p2001_p2, %p2000_p1 }
   0xa   :  { %p2003_p4 = pnand %p2002_p3, %p1996_p0 }
   0xc   :  { %2006 = shalt.err (!%p2003_p4)
}
   0xd   :  { %s2116_s27 = smov 256   ;;  %s2117_s28 = smov 16  }
   0xe   :  { %37 = dma.hbm_to_vmem [thread:$0]  %s2221_s1, 4096, %s32_s25, [#allocation6], %s2116_s27, %s2116_s27, %s2117_s28  }
   0xf   :  { %s2118_s8 = smov [#allocation8]  }
  0x10   :  { %s53_s9 = sshll.u32 %s2118_s8, 4  ;;  %s54_s9 = int_to_ptr.vmem [resolvable:$true] %s53_s9 }
  0x11   :  { %s2015_s10 = scalar_lea.vmem %s54_s9, 12288  ;;  %p2020_p6 = scmp.lt.s32.totalorder %s54_s9, %s54_s9 }
  0x12   :  { %p2016_p5 = scmp.ne.s32.totalorder %s54_s9, %s2015_s10  ;;  %p2021_p7 = scmp.lt.s32.totalorder %s2015_s10, %s2015_s10 }
  0x14   :  { %p2022_p8 = por %p2021_p7, %p2020_p6 }
  0x16   :  { %p2023_p9 = pnand %p2022_p8, %p2016_p5 }
  0x18   :  { %2026 = shalt.err (!%p2023_p9)
}
  0x19   :  { %s2119_s11 = smov 192   ;;  %s2120_s12 = smov 12  }
  0x1a   :  { %59 = dma.hbm_to_vmem [thread:$0]  %s2223_s3, 12288, %s54_s9, [#allocation9], %s2119_s11, %s2119_s11, %s2120_s12  }
  0x1b   :  { %s2121_s15 = smov [#allocation2]   ;;  %s2122_s17 = smov [#allocation7]  }
  0x1c   :  { %s22_s16 = sshll.u32 %s2121_s15, 4  ;;  %s44_s1 = sshll.u32 %s2122_s17, 4  ;;  %s23_s16 = int_to_ptr.vmem [resolvable:$true] %s22_s16  ;;  %s45_s1 = int_to_ptr.vmem [resolvable:$true] %s44_s1 }
  0x1d   :  { %s2035_s18 = scalar_lea.vmem %s23_s16, 128  ;;  %p2040_p11 = scmp.lt.s32.totalorder %s23_s16, %s23_s16 }
  0x1e   :  { %p2036_p10 = scmp.ne.s32.totalorder %s23_s16, %s2035_s18  ;;  %p2041_p12 = scmp.lt.s32.totalorder %s2035_s18, %s2035_s18 }
  0x20   :  { %p2042_p13 = por %p2041_p12, %p2040_p11 }
  0x22   :  { %p2043_p0 = pnand %p2042_p13, %p2036_p10 }
  0x24   :  { %2046 = shalt.err (!%p2043_p0)
}
  0x25   :  { %25 = dma.hbm_to_vmem [thread:$0]  %s2220_s0, 128, %s23_s16, [#allocation3]  }
  0x26   :  { %s2055_s21 = scalar_lea.vmem %s45_s1, 64  ;;  %p2060_p2 = scmp.lt.s32.totalorder %s45_s1, %s45_s1 }
  0x27   :  { %p2056_p1 = scmp.ne.s32.totalorder %s45_s1, %s2055_s21  ;;  %p2061_p3 = scmp.lt.s32.totalorder %s2055_s21, %s2055_s21 }
  0x29   :  { %p2062_p4 = por %p2061_p3, %p2060_p2 }
  0x2b   :  { %p2063_p5 = pnand %p2062_p4, %p2056_p1 }
  0x2d   :  { %2066 = shalt.err (!%p2063_p5)
}
  0x2e   :  { %47 = dma.hbm_to_vmem [thread:$0]  %s2222_s2, 64, %s45_s1, [#allocation6]  }
  0x2f   :  { %s2123_s23 = smov [#allocation10]  }
  0x30   :  { %s67_s24 = sshll.u32 %s2123_s23, 4  ;;  %s68_s24 = int_to_ptr.vmem [resolvable:$true] %s67_s24 }
  0x31   :  { %s2075_s25 = scalar_lea.vmem %s68_s24, 3072  ;;  %p2080_p7 = scmp.lt.s32.totalorder %s68_s24, %s68_s24 }
  0x32   :  { %p2076_p6 = scmp.ne.s32.totalorder %s68_s24, %s2075_s25  ;;  %p2081_p8 = scmp.lt.s32.totalorder %s2075_s25, %s2075_s25 }
  0x34   :  { %p2082_p9 = por %p2081_p8, %p2080_p7 }
  0x36   :  { %p2083_p10 = pnand %p2082_p9, %p2076_p6 }
  0x38   :  { %2086 = shalt.err (!%p2083_p10)
}
  0x39   :  { %s2124_s0 = smov 64   ;;  %s2125_s26 = smov 4  }
  0x3a   :  { %73 = dma.hbm_to_vmem [thread:$0]  %s2225_s5, 3072, %s68_s24, [#allocation9], %s2124_s0, %s2124_s0, %s2125_s26  }
  0x3b   :  { %2107 = dma.done.wait [#allocation3], 128  }
  0x3c   :  { %2108 = vsyncadd [#allocation3], 4294967168 }
  0x3d   :  { %2109 = dma.done.wait [#allocation6], 4160  }
  0x3e   :  { %2110 = vsyncadd [#allocation6], 4294963136 }
  0x3f   :  { %2111 = dma.done.wait [#allocation9], 15360  }
  0x40   :  { %2112 = vsyncadd [#allocation9], 4294951936  ;;  %v2126_v0 = vmov 0   ;;  %v1785_v1 = vld [vmem:[#allocation5 + $0xe4] ss:$16 sps:$4 sm:$0xff]   ;;  %v92_v33 = vld [vmem:[#allocation2] sm:$0xff] }
  0x41   :  { %340 = vmatprep.mubr.bf16.mxu0 %v2126_v0  ;;  %381 = vmatprep.mubr.bf16.mxu1 %v2126_v0  ;;  %v1787_v2 = vld [vmem:[#allocation5 + $0xec] ss:$16 sps:$4 sm:$0xff]   ;;  %v1789_v3 = vld [vmem:[#allocation5 + $0xe0] ss:$16 sps:$4 sm:$0xff]   ;;  %v1790_v4 = vld [vmem:[#allocation5 + $0xe8] ss:$16 sps:$4 sm:$0xff]   ;;  %v93_v36 = vpack.c.bf16 %v92_v33, %v92_v33 }
  0x42   :  { %308 = vmatprep.subr.bf16.mxu0 %v1785_v1  ;;  %349 = vmatprep.subr.bf16.mxu1 %v1787_v2  ;;  %v1791_v5 = vld [vmem:[#allocation5 + $0xc4] ss:$16 sps:$4 sm:$0xff]   ;;  %v1793_v6 = vld [vmem:[#allocation5 + $0xcc] ss:$16 sps:$4 sm:$0xff]   ;;  %v1795_v7 = vld [vmem:[#allocation5 + $0xc0] ss:$16 sps:$4 sm:$0xff]  }
  0x43   :  { %309 = vmatpush1.bf16.msra.mxu0 %v1789_v3  ;;  %350 = vmatpush1.bf16.msra.mxu1 %v1790_v4  ;;  %v1796_v8 = vld [vmem:[#allocation5 + $0xc8] ss:$16 sps:$4 sm:$0xff]   ;;  %v1797_v9 = vld [vmem:[#allocation5 + $0xa4] ss:$16 sps:$4 sm:$0xff]   ;;  %v1799_v10 = vld [vmem:[#allocation5 + $0xac] ss:$16 sps:$4 sm:$0xff]  }
  0x44   :  { %310 = vmatprep.subr.bf16.mxu0 %v1791_v5  ;;  %351 = vmatprep.subr.bf16.mxu1 %v1793_v6  ;;  %v1801_v11 = vld [vmem:[#allocation5 + $0xa0] ss:$16 sps:$4 sm:$0xff]   ;;  %v1802_v12 = vld [vmem:[#allocation5 + $0xa8] ss:$16 sps:$4 sm:$0xff]   ;;  %v1803_v13 = vld [vmem:[#allocation5 + $0x84] ss:$16 sps:$4 sm:$0xff]  }
  0x45   :  { %v1805_v14 = vld [vmem:[#allocation5 + $0x8c] ss:$16 sps:$4 sm:$0xff]   ;;  %v1807_v15 = vld [vmem:[#allocation5 + $0x80] ss:$16 sps:$4 sm:$0xff]   ;;  %v1808_v16 = vld [vmem:[#allocation5 + $0x88] ss:$16 sps:$4 sm:$0xff]  }
  0x46   :  { %v1809_v17 = vld [vmem:[#allocation5 + $0x64] ss:$16 sps:$4 sm:$0xff]   ;;  %v1811_v18 = vld [vmem:[#allocation5 + $0x6c] ss:$16 sps:$4 sm:$0xff]   ;;  %v1813_v19 = vld [vmem:[#allocation5 + $0x60] ss:$16 sps:$4 sm:$0xff]  }
  0x47   :  { %311 = vmatpush1.bf16.msra.mxu0 %v1795_v7  ;;  %352 = vmatpush1.bf16.msra.mxu1 %v1796_v8  ;;  %v1814_v20 = vld [vmem:[#allocation5 + $0x68] ss:$16 sps:$4 sm:$0xff]   ;;  %v1815_v21 = vld [vmem:[#allocation5 + $0x44] ss:$16 sps:$4 sm:$0xff]   ;;  %v1817_v22 = vld [vmem:[#allocation5 + $0x4c] ss:$16 sps:$4 sm:$0xff]  }
  0x48   :  { %312 = vmatprep.subr.bf16.mxu0 %v1797_v9  ;;  %353 = vmatprep.subr.bf16.mxu1 %v1799_v10  ;;  %v1819_v23 = vld [vmem:[#allocation5 + $0x40] ss:$16 sps:$4 sm:$0xff]   ;;  %v1820_v24 = vld [vmem:[#allocation5 + $0x48] ss:$16 sps:$4 sm:$0xff]   ;;  %v1821_v25 = vld [vmem:[#allocation5 + $0x24] ss:$16 sps:$4 sm:$0xff]  }
  0x49   :  { %v1823_v26 = vld [vmem:[#allocation5 + $0x2c] ss:$16 sps:$4 sm:$0xff]   ;;  %v1825_v27 = vld [vmem:[#allocation5 + $0x20] ss:$16 sps:$4 sm:$0xff]   ;;  %v1826_v28 = vld [vmem:[#allocation5 + $0x28] ss:$16 sps:$4 sm:$0xff]  }
  0x4a   :  { %v1827_v29 = vld [vmem:[#allocation5 + $0x4] ss:$16 sps:$4 sm:$0xff]   ;;  %v1829_v30 = vld [vmem:[#allocation5 + $0xc] ss:$16 sps:$4 sm:$0xff]   ;;  %v1831_v31 = vld [vmem:[#allocation5] ss:$16 sps:$4 sm:$0xff]  }
  0x4b   :  { %313 = vmatpush1.bf16.msra.mxu0 %v1801_v11  ;;  %354 = vmatpush1.bf16.msra.mxu1 %v1802_v12  ;;  %v1832_v32 = vld [vmem:[#allocation5 + $0x8] ss:$16 sps:$4 sm:$0xff]   ;;  %v1835_v34 = vld [vmem:[#allocation8 + $0xac] ss:$12 sps:$4 sm:$0xff]   ;;  %v1839_v41 = vld [vmem:[#allocation8 + $0x90] ss:$12 sps:$4 sm:$0xff]  }
  0x4c   :  { %314 = vmatprep.subr.bf16.mxu0 %v1803_v13  ;;  %355 = vmatprep.subr.bf16.mxu1 %v1805_v14  ;;  %v1838_v35 = vld [vmem:[#allocation8 + $0x22c] ss:$12 sps:$4 sm:$0xff]   ;;  %v1833_v37 = vld [vmem:[#allocation8 + $0xa8] ss:$12 sps:$4 sm:$0xff]   ;;  %v1842_v42 = vld [vmem:[#allocation8 + $0x210] ss:$12 sps:$4 sm:$0xff]  }
  0x4d   :  { %v1836_v38 = vld [vmem:[#allocation8 + $0x228] ss:$12 sps:$4 sm:$0xff]   ;;  %v1845_v45 = vld [vmem:[#allocation8 + $0x78] ss:$12 sps:$4 sm:$0xff]   ;;  %v1851_v49 = vld [vmem:[#allocation8 + $0x60] ss:$12 sps:$4 sm:$0xff]  }
  0x4e   :  { %v1841_v39 = vld [vmem:[#allocation8 + $0x94] ss:$12 sps:$4 sm:$0xff]   ;;  %v1847_v43 = vld [vmem:[#allocation8 + $0x7c] ss:$12 sps:$4 sm:$0xff]   ;;  %v1848_v46 = vld [vmem:[#allocation8 + $0x1f8] ss:$12 sps:$4 sm:$0xff]  }
  0x4f   :  { %315 = vmatpush1.bf16.msra.mxu0 %v1807_v15  ;;  %356 = vmatpush1.bf16.msra.mxu1 %v1808_v16  ;;  %v1844_v40 = vld [vmem:[#allocation8 + $0x214] ss:$12 sps:$4 sm:$0xff]   ;;  %v1850_v44 = vld [vmem:[#allocation8 + $0x1fc] ss:$12 sps:$4 sm:$0xff]   ;;  %v1853_v47 = vld [vmem:[#allocation8 + $0x64] ss:$12 sps:$4 sm:$0xff]  }
  0x50   :  { %316 = vmatprep.subr.bf16.mxu0 %v1809_v17  ;;  %357 = vmatprep.subr.bf16.mxu1 %v1811_v18  ;;  %v1856_v48 = vld [vmem:[#allocation8 + $0x1e4] ss:$12 sps:$4 sm:$0xff]   ;;  %v1854_v50 = vld [vmem:[#allocation8 + $0x1e0] ss:$12 sps:$4 sm:$0xff]   ;;  %v1857_v53 = vld [vmem:[#allocation8 + $0x48] ss:$12 sps:$4 sm:$0xff]  }
  0x51   :  { %v1859_v51 = vld [vmem:[#allocation8 + $0x4c] ss:$12 sps:$4 sm:$0xff]   ;;  %v1860_v54 = vld [vmem:[#allocation8 + $0x1c8] ss:$12 sps:$4 sm:$0xff]   ;;  %v1863_v57 = vld [vmem:[#allocation8 + $0x30] ss:$12 sps:$4 sm:$0xff]  }
  0x52   :  { %v1862_v52 = vld [vmem:[#allocation8 + $0x1cc] ss:$12 sps:$4 sm:$0xff]   ;;  %v1865_v55 = vld [vmem:[#allocation8 + $0x34] ss:$12 sps:$4 sm:$0xff]   ;;  %v1866_v58 = vld [vmem:[#allocation8 + $0x1b0] ss:$12 sps:$4 sm:$0xff]  }
  0x53   :  { %317 = vmatpush1.bf16.msra.mxu0 %v1813_v19  ;;  %358 = vmatpush1.bf16.msra.mxu1 %v1814_v20  ;;  %v1868_v56 = vld [vmem:[#allocation8 + $0x1b4] ss:$12 sps:$4 sm:$0xff]   ;;  %v1871_v59 = vld [vmem:[#allocation8 + $0x1c] ss:$12 sps:$4 sm:$0xff]   ;;  %v1869_v61 = vld [vmem:[#allocation8 + $0x18] ss:$12 sps:$4 sm:$0xff]  }
  0x54   :  { %318 = vmatprep.subr.bf16.mxu0 %v1815_v21  ;;  %359 = vmatprep.subr.bf16.mxu1 %v1817_v22  ;;  %v1874_v60 = vld [vmem:[#allocation8 + $0x19c] ss:$12 sps:$4 sm:$0xff]   ;;  %v1872_v62 = vld [vmem:[#allocation8 + $0x198] ss:$12 sps:$4 sm:$0xff]   ;;  %v1875_v1 = vld [vmem:[#allocation8] ss:$12 sps:$4 sm:$0xff]  }
  0x55   :  { %v1877_v63 = vld [vmem:[#allocation8 + $0x4] ss:$12 sps:$4 sm:$0xff]   ;;  %v1878_v2 = vld [vmem:[#allocation8 + $0x180] ss:$12 sps:$4 sm:$0xff]   ;;  %v1881_v5 = vld [vmem:[#allocation8 + $0x168] ss:$12 sps:$4 sm:$0xff]  }
  0x56   :  { %v1880_v0 = vld [vmem:[#allocation8 + $0x184] ss:$12 sps:$4 sm:$0xff]   ;;  %v1883_v3 = vld [vmem:[#allocation8 + $0x16c] ss:$12 sps:$4 sm:$0xff]   ;;  %v1884_v6 = vld [vmem:[#allocation8 + $0x2e8] ss:$12 sps:$4 sm:$0xff]  }
  0x57   :  { %319 = vmatpush1.bf16.msra.mxu0 %v1819_v23  ;;  %360 = vmatpush1.bf16.msra.mxu1 %v1820_v24  ;;  %v1886_v4 = vld [vmem:[#allocation8 + $0x2ec] ss:$12 sps:$4 sm:$0xff]   ;;  %v1889_v7 = vld [vmem:[#allocation8 + $0x154] ss:$12 sps:$4 sm:$0xff]   ;;  %v1887_v9 = vld [vmem:[#allocation8 + $0x150] ss:$12 sps:$4 sm:$0xff]  }
  0x58   :  { %320 = vmatprep.subr.bf16.mxu0 %v1821_v25  ;;  %361 = vmatprep.subr.bf16.mxu1 %v1823_v26  ;;  %v1892_v8 = vld [vmem:[#allocation8 + $0x2d4] ss:$12 sps:$4 sm:$0xff]   ;;  %v1890_v10 = vld [vmem:[#allocation8 + $0x2d0] ss:$12 sps:$4 sm:$0xff]   ;;  %v1893_v13 = vld [vmem:[#allocation8 + $0x138] ss:$12 sps:$4 sm:$0xff]  }
  0x59   :  { %v1895_v11 = vld [vmem:[#allocation8 + $0x13c] ss:$12 sps:$4 sm:$0xff]   ;;  %v1896_v14 = vld [vmem:[#allocation8 + $0x2b8] ss:$12 sps:$4 sm:$0xff]   ;;  %v1899_v17 = vld [vmem:[#allocation8 + $0x120] ss:$12 sps:$4 sm:$0xff]  }
  0x5a   :  { %v1898_v12 = vld [vmem:[#allocation8 + $0x2bc] ss:$12 sps:$4 sm:$0xff]   ;;  %v1901_v15 = vld [vmem:[#allocation8 + $0x124] ss:$12 sps:$4 sm:$0xff]   ;;  %v1902_v18 = vld [vmem:[#allocation8 + $0x2a0] ss:$12 sps:$4 sm:$0xff]  }
  0x5b   :  { %321 = vmatpush1.bf16.msra.mxu0 %v1825_v27  ;;  %362 = vmatpush1.bf16.msra.mxu1 %v1826_v28  ;;  %v1904_v16 = vld [vmem:[#allocation8 + $0x2a4] ss:$12 sps:$4 sm:$0xff]   ;;  %v1907_v19 = vld [vmem:[#allocation8 + $0x10c] ss:$12 sps:$4 sm:$0xff]   ;;  %v1905_v21 = vld [vmem:[#allocation8 + $0x108] ss:$12 sps:$4 sm:$0xff]  }
  0x5c   :  { %322 = vmatprep.subr.bf16.mxu0 %v1827_v29  ;;  %363 = vmatprep.subr.bf16.mxu1 %v1829_v30  ;;  %v1910_v20 = vld [vmem:[#allocation8 + $0x28c] ss:$12 sps:$4 sm:$0xff]   ;;  %v1908_v22 = vld [vmem:[#allocation8 + $0x288] ss:$12 sps:$4 sm:$0xff]   ;;  %v1911_v25 = vld [vmem:[#allocation8 + $0xf0] ss:$12 sps:$4 sm:$0xff]  }
  0x5d   :  { %v1913_v23 = vld [vmem:[#allocation8 + $0xf4] ss:$12 sps:$4 sm:$0xff]   ;;  %v1914_v26 = vld [vmem:[#allocation8 + $0x270] ss:$12 sps:$4 sm:$0xff]   ;;  %v1917_v29 = vld [vmem:[#allocation8 + $0xd8] ss:$12 sps:$4 sm:$0xff]  }
  0x5e   :  { %v1916_v24 = vld [vmem:[#allocation8 + $0x274] ss:$12 sps:$4 sm:$0xff]   ;;  %v1919_v27 = vld [vmem:[#allocation8 + $0xdc] ss:$12 sps:$4 sm:$0xff]   ;;  %v1920_v30 = vld [vmem:[#allocation8 + $0x258] ss:$12 sps:$4 sm:$0xff]  }
  0x5f   :  { %323 = vmatpush1.bf16.msra.mxu0 %v1831_v31  ;;  %364 = vmatpush1.bf16.msra.mxu1 %v1832_v32  ;;  %v1922_v28 = vld [vmem:[#allocation8 + $0x25c] ss:$12 sps:$4 sm:$0xff]   ;;  %v1925_v31 = vld [vmem:[#allocation8 + $0xc4] ss:$12 sps:$4 sm:$0xff]   ;;  %v1923_v33 = vld [vmem:[#allocation8 + $0xc0] ss:$12 sps:$4 sm:$0xff]  }
  0x60   :  { %1055 = vmatprep.subr.bf16.mxu0 %v1835_v34  ;;  %1096 = vmatprep.subr.bf16.mxu1 %v1838_v35  ;;  %v1928_v32 = vld [vmem:[#allocation8 + $0x244] ss:$12 sps:$4 sm:$0xff]   ;;  %v1926_v34 = vld [vmem:[#allocation8 + $0x240] ss:$12 sps:$4 sm:$0xff]   ;;  %vm2128_vm0 = vmmov 0   ;;  %s2129_s30 = smov [#allocation11]  }
  0x61   :  { %v1929_v35 = vld [vmem:[#allocation8 + $0x170] ss:$12 sps:$4 sm:$0xff]   ;;  %s1511_s8 = sshll.u32 %s2129_s30, 4  ;;  %s1512_s8 = int_to_ptr.vmem [resolvable:$true] %s1511_s8 }
  0x62   :  { %341 = vmatmul.mubr.bf16.vlgmr.msra.gmra.mxu0 %v93_v36  ;;  %382 = vmatmul.mubr.bf16.vlgmr.msra.gmra.mxu1 %v93_v36  ;;  %v1930_v36 = vld [vmem:[#allocation8 + $0x2f0] ss:$12 sps:$4 sm:$0xff]   ;;  %s2087_s9 = scalar_lea.vmem %s1512_s8, 128  ;;  %p2092_p12 = scmp.lt.s32.totalorder %s1512_s8, %s1512_s8 }
  0x63   :  { %1056 = vmatpush1.bf16.msra.mxu0 %v1833_v37  ;;  %1097 = vmatpush1.bf16.msra.mxu1 %v1836_v38  ;;  %v128_v37 = vlaneseq  ;;  %p2088_p11 = scmp.ne.s32.totalorder %s1512_s8, %s2087_s9  ;;  %p2093_p13 = scmp.lt.s32.totalorder %s2087_s9, %s2087_s9 }
  0x64   :  { %1057 = vmatprep.subr.bf16.mxu0 %v1841_v39  ;;  %1098 = vmatprep.subr.bf16.mxu1 %v1844_v40 }
  0x65   :  { %v2185_v38 = vshrl.u32 %v128_v37, 7  ;;  %v1964_v37 = vld [vmem:[#allocation10 + $0x30] sm:$0xff]   ;;  %p2094_p0 = por %p2093_p13, %p2092_p12 }
  0x67   :  { %1058 = vmatpush1.bf16.msra.mxu0 %v1839_v41  ;;  %1099 = vmatpush1.bf16.msra.mxu1 %v1842_v42  ;;  %v130_v39 = vsub.s32 0, %v2185_v38  ;;  %v138_v40 = vsub.s32 2, %v2185_v38  ;;  %v126_v41 = vld [vmem:[#allocation7] sm:$0xf]  ;;  %v134_v42 = vsub.s32 1, %v2185_v38  ;;  %p2095_p1 = pnand %p2094_p0, %p2088_p11 }
  0x68   :  { %1059 = vmatprep.subr.bf16.mxu0 %v1847_v43  ;;  %1100 = vmatprep.subr.bf16.mxu1 %v1850_v44  ;;  %v142_v43 = vsub.s32 3, %v2185_v38  ;;  %v1650_v38 = vld [vmem:[%s2226_s6] ss:$0 sm:$0xff] }
  0x69   :  { %v131_v44 = vrot.slane %v126_v41, %v130_v39 }
  0x6b   :  { %1060 = vmatpush1.bf16.msra.mxu0 %v1845_v45  ;;  %1101 = vmatpush1.bf16.msra.mxu1 %v1848_v46  ;;  %v139_v45 = vrot.slane %v126_v41, %v138_v40  ;;  %v135_v46 = vrot.slane %v126_v41, %v134_v42 }
  0x6c   :  { %1061 = vmatprep.subr.bf16.mxu0 %v1853_v47  ;;  %1102 = vmatprep.subr.bf16.mxu1 %v1856_v48  ;;  %v143_v47 = vrot.slane %v126_v41, %v142_v43  ;;  %v1965_v41 = vld [vmem:[#allocation10 + $0x68] sm:$0xff]  }
  0x6d   :  { %v1966_v43 = vld [vmem:[#allocation10 + $0x28] sm:$0xff]  }
  0x6f   :  { %1062 = vmatpush1.bf16.msra.mxu0 %v1851_v49  ;;  %1103 = vmatpush1.bf16.msra.mxu1 %v1854_v50 }
  0x70   :  { %1063 = vmatprep.subr.bf16.mxu0 %v1859_v51  ;;  %1104 = vmatprep.subr.bf16.mxu1 %v1862_v52 }
  0x73   :  { %1064 = vmatpush1.bf16.msra.mxu0 %v1857_v53  ;;  %1105 = vmatpush1.bf16.msra.mxu1 %v1860_v54 }
  0x74   :  { %1065 = vmatprep.subr.bf16.mxu0 %v1865_v55  ;;  %1106 = vmatprep.subr.bf16.mxu1 %v1868_v56 }
  0x77   :  { %1066 = vmatpush1.bf16.msra.mxu0 %v1863_v57  ;;  %1107 = vmatpush1.bf16.msra.mxu1 %v1866_v58 }
  0x78   :  { %1067 = vmatprep.subr.bf16.mxu0 %v1871_v59  ;;  %1108 = vmatprep.subr.bf16.mxu1 %v1874_v60 }
  0x7b   :  { %1068 = vmatpush1.bf16.msra.mxu0 %v1869_v61  ;;  %1109 = vmatpush1.bf16.msra.mxu1 %v1872_v62 }
  0x7c   :  { %1069 = vmatprep.subr.bf16.mxu0 %v1877_v63  ;;  %1110 = vmatprep.subr.bf16.mxu1 %v1880_v0 }
  0x7f   :  { %1070 = vmatpush1.bf16.msra.mxu0 %v1875_v1  ;;  %1111 = vmatpush1.bf16.msra.mxu1 %v1878_v2 }
  0x80   :  { %1071 = vmatprep.subr.bf16.mxu0 %v1883_v3  ;;  %1112 = vmatprep.subr.bf16.mxu1 %v1886_v4  ;;  %v1931_v3 = vld [vmem:[#allocation8 + $0xb0] ss:$12 sps:$4 sm:$0xff]  }
  0x81   :  { %v1932_v4 = vld [vmem:[#allocation8 + $0x230] ss:$12 sps:$4 sm:$0xff]  }
  0x83   :  { %1072 = vmatpush2.bf16.msra.mxu0 %v1881_v5  ;;  %1113 = vmatpush2.bf16.msra.mxu1 %v1884_v6  ;;  %v1933_v6 = vld [vmem:[#allocation8 + $0x158] ss:$12 sps:$4 sm:$0xff]  }
  0x84   :  { %1073 = vmatprep.subr.bf16.mxu0 %v1889_v7  ;;  %1114 = vmatprep.subr.bf16.mxu1 %v1892_v8  ;;  %v1934_v7 = vld [vmem:[#allocation8 + $0x2d8] ss:$12 sps:$4 sm:$0xff]  }
  0x85   :  { %v1935_v8 = vld [vmem:[#allocation8 + $0x98] ss:$12 sps:$4 sm:$0xff]  }
  0x87   :  { %1074 = vmatpush2.bf16.msra.mxu0 %v1887_v9  ;;  %1115 = vmatpush2.bf16.msra.mxu1 %v1890_v10  ;;  %v1936_v9 = vld [vmem:[#allocation8 + $0x218] ss:$12 sps:$4 sm:$0xff]   ;;  %v1937_v10 = vld [vmem:[#allocation8 + $0x140] ss:$12 sps:$4 sm:$0xff]  }
  0x88   :  { %1075 = vmatprep.subr.bf16.mxu0 %v1895_v11  ;;  %1116 = vmatprep.subr.bf16.mxu1 %v1898_v12  ;;  %v1938_v11 = vld [vmem:[#allocation8 + $0x2c0] ss:$12 sps:$4 sm:$0xff]  }
  0x89   :  { %v1939_v12 = vld [vmem:[#allocation8 + $0x80] ss:$12 sps:$4 sm:$0xff]  }
  0x8b   :  { %1076 = vmatpush2.bf16.msra.mxu0 %v1893_v13  ;;  %1117 = vmatpush2.bf16.msra.mxu1 %v1896_v14  ;;  %v1940_v13 = vld [vmem:[#allocation8 + $0x200] ss:$12 sps:$4 sm:$0xff]   ;;  %v1941_v14 = vld [vmem:[#allocation8 + $0x128] ss:$12 sps:$4 sm:$0xff]  }
  0x8c   :  { %1077 = vmatprep.subr.bf16.mxu0 %v1901_v15  ;;  %1118 = vmatprep.subr.bf16.mxu1 %v1904_v16  ;;  %v1942_v15 = vld [vmem:[#allocation8 + $0x2a8] ss:$12 sps:$4 sm:$0xff]  }
  0x8d   :  { %v1943_v16 = vld [vmem:[#allocation8 + $0x68] ss:$12 sps:$4 sm:$0xff]  }
  0x8f   :  { %1078 = vmatpush2.bf16.msra.mxu0 %v1899_v17  ;;  %1119 = vmatpush2.bf16.msra.mxu1 %v1902_v18  ;;  %v1944_v17 = vld [vmem:[#allocation8 + $0x1e8] ss:$12 sps:$4 sm:$0xff]   ;;  %v1945_v18 = vld [vmem:[#allocation8 + $0x110] ss:$12 sps:$4 sm:$0xff]  }
  0x90   :  { %1079 = vmatprep.subr.bf16.mxu0 %v1907_v19  ;;  %1120 = vmatprep.subr.bf16.mxu1 %v1910_v20  ;;  %v1946_v19 = vld [vmem:[#allocation8 + $0x290] ss:$12 sps:$4 sm:$0xff]  }
  0x91   :  { %v1947_v20 = vld [vmem:[#allocation8 + $0x50] ss:$12 sps:$4 sm:$0xff]  }
  0x93   :  { %1080 = vmatpush2.bf16.msra.mxu0 %v1905_v21  ;;  %1121 = vmatpush2.bf16.msra.mxu1 %v1908_v22  ;;  %v1948_v21 = vld [vmem:[#allocation8 + $0x1d0] ss:$12 sps:$4 sm:$0xff]   ;;  %v1949_v22 = vld [vmem:[#allocation8 + $0xf8] ss:$12 sps:$4 sm:$0xff]  }
  0x94   :  { %1081 = vmatprep.subr.bf16.mxu0 %v1913_v23  ;;  %1122 = vmatprep.subr.bf16.mxu1 %v1916_v24  ;;  %v1950_v23 = vld [vmem:[#allocation8 + $0x278] ss:$12 sps:$4 sm:$0xff]  }
  0x95   :  { %v1951_v24 = vld [vmem:[#allocation8 + $0x38] ss:$12 sps:$4 sm:$0xff]  }
  0x97   :  { %1082 = vmatpush2.bf16.msra.mxu0 %v1911_v25  ;;  %1123 = vmatpush2.bf16.msra.mxu1 %v1914_v26  ;;  %v1952_v25 = vld [vmem:[#allocation8 + $0x1b8] ss:$12 sps:$4 sm:$0xff]   ;;  %v1953_v26 = vld [vmem:[#allocation8 + $0xe0] ss:$12 sps:$4 sm:$0xff]  }
  0x98   :  { %1083 = vmatprep.subr.bf16.mxu0 %v1919_v27  ;;  %1124 = vmatprep.subr.bf16.mxu1 %v1922_v28  ;;  %v1954_v27 = vld [vmem:[#allocation8 + $0x260] ss:$12 sps:$4 sm:$0xff]  }
  0x99   :  { %v1955_v28 = vld [vmem:[#allocation8 + $0x20] ss:$12 sps:$4 sm:$0xff]  }
  0x9b   :  { %1084 = vmatpush2.bf16.msra.mxu0 %v1917_v29  ;;  %1125 = vmatpush2.bf16.msra.mxu1 %v1920_v30  ;;  %v1956_v29 = vld [vmem:[#allocation8 + $0x1a0] ss:$12 sps:$4 sm:$0xff]   ;;  %v1957_v30 = vld [vmem:[#allocation8 + $0xc8] ss:$12 sps:$4 sm:$0xff]  }
  0x9c   :  { %1085 = vmatprep.subr.bf16.mxu0 %v1925_v31  ;;  %1126 = vmatprep.subr.bf16.mxu1 %v1928_v32  ;;  %v1958_v31 = vld [vmem:[#allocation8 + $0x248] ss:$12 sps:$4 sm:$0xff]  }
  0x9d   :  { %v1959_v32 = vld [vmem:[#allocation8 + $0x8] ss:$12 sps:$4 sm:$0xff]  }
  0x9f   :  { %1086 = vmatpush2.bf16.msra.mxu0 %v1923_v33  ;;  %1127 = vmatpush2.bf16.msra.mxu1 %v1926_v34  ;;  %v1960_v33 = vld [vmem:[#allocation8 + $0x188] ss:$12 sps:$4 sm:$0xff]   ;;  %v1961_v34 = vld [vmem:[#allocation10 + $0x78] sm:$0xff]  }
  0xa0   :  { %1675 = vmatprep.subr.bf16.mxu0 %v1929_v35  ;;  %1697 = vmatprep.subr.bf16.mxu1 %v1930_v36  ;;  %v1962_v35 = vld [vmem:[#allocation10 + $0x38] sm:$0xff]   ;;  %v1963_v36 = vld [vmem:[#allocation10 + $0x70] sm:$0xff]  }
 0x122   :  { %v342_v48 = vpop.f32.mrf.mxu0  ;;  %v383_v49 = vpop.f32.mrf.mxu1 }
 0x123   :  { %v343_v50 = vadd.f32 %v342_v48, %v131_v44  ;;  %v384_v51 = vadd.f32 %v383_v49, %v139_v45  ;;  %v1967_v44 = vld [vmem:[#allocation10 + $0x60] sm:$0xff]   ;;  %v1971_v48 = vld [vmem:[#allocation10 + $0x50] sm:$0xff]  }
 0x124   :  { %v344_v52 = vpop.f32.mrf.mxu0  ;;  %v385_v53 = vpop.f32.mrf.mxu1  ;;  %v1968_v45 = vld [vmem:[#allocation10 + $0x20] sm:$0xff]   ;;  %v1972_v49 = vld [vmem:[#allocation10 + $0x10] sm:$0xff]  }
 0x125   :  { %v392_v54 = vmax.f32 %v384_v51, 0.0  ;;  %v345_v55 = vadd.f32 %v344_v52, %v135_v46  ;;  %v386_v56 = vadd.f32 %v385_v53, %v143_v47  ;;  %v390_v57 = vmax.f32 %v343_v50, 0.0  ;;  %v1969_v46 = vld [vmem:[#allocation10 + $0x58] sm:$0xff]   ;;  %v1973_v50 = vld [vmem:[#allocation10 + $0x48] sm:$0xff]   ;;  %v1975_v52 = vld [vmem:[#allocation10 + $0x40] sm:$0xff]  }
 0x126   :  { %v346_v58 = vpop.f32.mrf.mxu0  ;;  %v387_v59 = vpop.f32.mrf.mxu1  ;;  %v1970_v47 = vld [vmem:[#allocation10 + $0x18] sm:$0xff]   ;;  %v1974_v51 = vld [vmem:[#allocation10 + $0x8] sm:$0xff]   ;;  %v1976_v53 = vld [vmem:[#allocation10] sm:$0xff]  }
 0x127   :  { %v391_v60 = vmax.f32 %v345_v55, 0.0  ;;  %v393_v61 = vmax.f32 %v386_v56, 0.0  ;;  %v2197_v62 = vpack.c.bf16 %v392_v54, %v392_v54  ;;  %v2199_v5 = vpack.c.bf16 %v390_v57, %v390_v57  ;;  %v1977_v54 = vld [vmem:[#allocation10 + $0xb8] sm:$0xff]   ;;  %v1978_v56 = vld [vmem:[#allocation10 + $0xb0] sm:$0xff]   ;;  %v1979_v57 = vld [vmem:[#allocation10 + $0xa8] sm:$0xff]  }
 0x128   :  { %v347_v63 = vpop.f32.mrf.mxu0  ;;  %v388_v0 = vpop.f32.mrf.mxu1  ;;  %v2127_v55 = vmov 0.0   ;;  %v1980_v58 = vld [vmem:[#allocation10 + $0xa0] sm:$0xff]   ;;  %v1981_v59 = vld [vmem:[#allocation10 + $0x98] sm:$0xff]  }
 0x129   :  { %v395_v1 = vpack.c.bf16 %v391_v60, %v391_v60  ;;  %v397_v2 = vpack.c.bf16 %v393_v61, %v393_v61  ;;  %v1982_v60 = vld [vmem:[#allocation10 + $0x90] sm:$0xff]   ;;  %v1983_v61 = vld [vmem:[#allocation10 + $0x88] sm:$0xff]  }
 0x12a   :  { %v526_v63 = vld [vmem:[%s2224_s4] sm:$0x7] }
 0x12b   :  { %1087 = vmatprep.mubr.bf16.mxu0 %v395_v1  ;;  %1128 = vmatprep.mubr.bf16.mxu1 %v397_v2  ;;  %v531_v0 = vrot.slane %v526_v63, %v130_v39 }
 0x12c   :  { %1088 = vmatmul.mubr.bf16.vlgmr.msra.gmra.mxu0 %v2199_v5  ;;  %1129 = vmatmul.mubr.bf16.vlgmr.msra.gmra.mxu1 %v2197_v62 }
 0x12d   :  { %1676 = vmatpush3.bf16.msra.mxu0 %v1931_v3  ;;  %1698 = vmatpush3.bf16.msra.mxu1 %v1932_v4 }
 0x12e   :  { %1169 = vmatprep.mubr.bf16.mxu0 %v395_v1  ;;  %1209 = vmatprep.mubr.bf16.mxu1 %v397_v2  ;;  %v535_v1 = vrot.slane %v526_v63, %v134_v42 }
 0x12f   :  { %1677 = vmatprep.subr.bf16.mxu0 %v1933_v6  ;;  %1699 = vmatprep.subr.bf16.mxu1 %v1934_v7 }
 0x131   :  { %1678 = vmatpush3.bf16.msra.mxu0 %v1935_v8  ;;  %1700 = vmatpush3.bf16.msra.mxu1 %v1936_v9 }
 0x132   :  { %1679 = vmatprep.subr.bf16.mxu0 %v1937_v10  ;;  %1701 = vmatprep.subr.bf16.mxu1 %v1938_v11 }
 0x135   :  { %1680 = vmatpush3.bf16.msra.mxu0 %v1939_v12  ;;  %1702 = vmatpush3.bf16.msra.mxu1 %v1940_v13 }
 0x136   :  { %1681 = vmatprep.subr.bf16.mxu0 %v1941_v14  ;;  %1703 = vmatprep.subr.bf16.mxu1 %v1942_v15 }
 0x139   :  { %1682 = vmatpush3.bf16.msra.mxu0 %v1943_v16  ;;  %1704 = vmatpush3.bf16.msra.mxu1 %v1944_v17 }
 0x13a   :  { %1683 = vmatprep.subr.bf16.mxu0 %v1945_v18  ;;  %1705 = vmatprep.subr.bf16.mxu1 %v1946_v19  ;;  %v539_v18 = vrot.slane %v526_v63, %v138_v40 }
 0x13d   :  { %1684 = vmatpush3.bf16.msra.mxu0 %v1947_v20  ;;  %1706 = vmatpush3.bf16.msra.mxu1 %v1948_v21 }
 0x13e   :  { %1685 = vmatprep.subr.bf16.mxu0 %v1949_v22  ;;  %1707 = vmatprep.subr.bf16.mxu1 %v1950_v23 }
 0x141   :  { %1686 = vmatpush3.bf16.msra.mxu0 %v1951_v24  ;;  %1708 = vmatpush3.bf16.msra.mxu1 %v1952_v25 }
 0x142   :  { %1687 = vmatprep.subr.bf16.mxu0 %v1953_v26  ;;  %1709 = vmatprep.subr.bf16.mxu1 %v1954_v27 }
 0x145   :  { %1688 = vmatpush3.bf16.msra.mxu0 %v1955_v28  ;;  %1710 = vmatpush3.bf16.msra.mxu1 %v1956_v29 }
 0x146   :  { %1689 = vmatprep.subr.bf16.mxu0 %v1957_v30  ;;  %1711 = vmatprep.subr.bf16.mxu1 %v1958_v31 }
 0x149   :  { %1690 = vmatpush3.bf16.msra.mxu0 %v1959_v32  ;;  %1712 = vmatpush3.bf16.msra.mxu1 %v1960_v33 }
 0x14a   :  { %1719 = vmatprep.subr.bf16.mxu0 %v1961_v34  ;;  %1750 = vmatprep.subr.bf16.mxu1 %v2127_v55 }
 0x14c   :  { %1170 = vmatmul.mubr.bf16.vlgmr.msra.gmra.mxu0 %v2199_v5  ;;  %1210 = vmatmul.mubr.bf16.vlgmr.msra.gmra.mxu1 %v2197_v62  ;;  %v1984_v62 = vld [vmem:[#allocation10 + $0x80] sm:$0xff]  }
 0x14d   :  { %1720 = vmatpush3.bf16.msra.mxu0 %v1962_v35  ;;  %1751 = vmatpush3.bf16.msra.mxu1 %v1977_v54 }
 0x14e   :  { %1721 = vmatprep.subr.bf16.mxu0 %v1963_v36  ;;  %1752 = vmatprep.subr.bf16.mxu1 %v2127_v55 }
 0x14f   :  { %1766 = vmatprep.mubr.msk.bf16.mxu1 %vm2128_vm0, %v2127_v55 }
 0x151   :  { %1722 = vmatpush3.bf16.msra.mxu0 %v1964_v37  ;;  %1753 = vmatpush3.bf16.msra.mxu1 %v1978_v56 }
 0x152   :  { %1723 = vmatprep.subr.bf16.mxu0 %v1965_v41  ;;  %1754 = vmatprep.subr.bf16.mxu1 %v2127_v55 }
 0x155   :  { %1724 = vmatpush3.bf16.msra.mxu0 %v1966_v43  ;;  %1755 = vmatpush3.bf16.msra.mxu1 %v1979_v57 }
 0x156   :  { %1725 = vmatprep.subr.bf16.mxu0 %v1967_v44  ;;  %1756 = vmatprep.subr.bf16.mxu1 %v2127_v55 }
 0x159   :  { %1726 = vmatpush3.bf16.msra.mxu0 %v1968_v45  ;;  %1757 = vmatpush3.bf16.msra.mxu1 %v1980_v58 }
 0x15a   :  { %1727 = vmatprep.subr.bf16.mxu0 %v1969_v46  ;;  %1758 = vmatprep.subr.bf16.mxu1 %v2127_v55 }
 0x15d   :  { %1728 = vmatpush3.bf16.msra.mxu0 %v1970_v47  ;;  %1759 = vmatpush3.bf16.msra.mxu1 %v1981_v59 }
 0x15e   :  { %1729 = vmatprep.subr.bf16.mxu0 %v1971_v48  ;;  %1760 = vmatprep.subr.bf16.mxu1 %v2127_v55 }
 0x161   :  { %1730 = vmatpush3.bf16.msra.mxu0 %v1972_v49  ;;  %1761 = vmatpush3.bf16.msra.mxu1 %v1982_v60 }
 0x162   :  { %1731 = vmatprep.subr.bf16.mxu0 %v1973_v50  ;;  %1762 = vmatprep.subr.bf16.mxu1 %v2127_v55 }
 0x165   :  { %1732 = vmatpush3.bf16.msra.mxu0 %v1974_v51  ;;  %1763 = vmatpush3.bf16.msra.mxu1 %v1983_v61 }
 0x166   :  { %1733 = vmatprep.subr.bf16.mxu0 %v1975_v52  ;;  %1764 = vmatprep.subr.bf16.mxu1 %v2127_v55 }
 0x169   :  { %1734 = vmatpush3.bf16.msra.mxu0 %v1976_v53  ;;  %1765 = vmatpush3.bf16.msra.mxu1 %v1984_v62 }
 0x1ec   :  { %v1089_v2 = vpop.f32.mrf.mxu0  ;;  %v1130_v3 = vpop.f32.mrf.mxu1 }
 0x1ed   :  { %v1090_v4 = vadd.f32 %v1089_v2, %v531_v0 }
 0x1ee   :  { %v1091_v5 = vpop.f32.mrf.mxu0  ;;  %v1132_v6 = vpop.f32.mrf.mxu1 }
 0x1ef   :  { %v1131_v7 = vadd.f32 %v1130_v3, %v1090_v4  ;;  %v1092_v8 = vadd.f32 %v1091_v5, %v535_v1 }
 0x1f0   :  { %v1093_v9 = vpop.f32.mrf.mxu0  ;;  %v1134_v10 = vpop.f32.mrf.mxu1 }
 0x1f1   :  { %v1133_v11 = vadd.f32 %v1132_v6, %v1092_v8  ;;  %v1217_v12 = vmax.f32 %v1131_v7, 0.0 }
 0x1f2   :  { %v1094_v13 = vpop.f32.mrf.mxu0  ;;  %v1135_v14 = vpop.f32.mrf.mxu1 }
 0x1f3   :  { %v1218_v15 = vmax.f32 %v1133_v11, 0.0  ;;  %v1220_v17 = vpack.c.bf16 %v1217_v12, %v1217_v12 }
 0x1f5   :  { %v1221_v16 = vpack.c.bf16 %v1218_v15, %v1218_v15 }
 0x1f7   :  { %1454 = vmatprep.mubr.bf16.mxu0 %v1221_v16 }
 0x1f8   :  { %1455 = vmatmul.mubr.bf16.vlgmr.msra.gmra.mxu0 %v1220_v17 }
 0x20c   :  { %v1691_v39 = vpop.f32.mrf.mxu0  ;;  %v1713_v42 = vpop.f32.mrf.mxu1 }
 0x20e   :  { %v1692_v19 = vpop.f32.mrf.mxu0  ;;  %v1714_v20 = vpop.f32.mrf.mxu1 }
 0x20f   :  { %v1693_v21 = vadd.f32 %v1692_v19, %v1691_v39  ;;  %v1715_v25 = vadd.f32 %v1714_v20, %v1713_v42 }
 0x210   :  { %v1694_v22 = vpop.f32.mrf.mxu0  ;;  %v1716_v23 = vpop.f32.mrf.mxu1 }
 0x211   :  { %v1172_v24 = vadd.f32 %v1693_v21, %v539_v18 }
 0x212   :  { %v1695_v26 = vpop.f32.mrf.mxu0  ;;  %v1717_v27 = vpop.f32.mrf.mxu1 }
 0x213   :  { %v1212_v28 = vadd.f32 %v1715_v25, %v1172_v24 }
 0x215   :  { %v1219_v29 = vmax.f32 %v1212_v28, 0.0 }
 0x217   :  { %v1222_v30 = vpack.c.bf16 %v1219_v29, %v1219_v29 }
 0x219   :  { %1767 = vmatmul.mubr.bf16.vlgmr.msra.gmra.mxu1 %v1222_v30 }
 0x2b8   :  { %v1735_v31 = vpop.f32.mrf.mxu0 }
 0x2ba   :  { %v1736_v32 = vpop.f32.mrf.mxu0 }
 0x2bb   :  { %v1737_v35 = vadd.f32 %v1736_v32, %v1735_v31 }
 0x2bc   :  { %v1738_v33 = vpop.f32.mrf.mxu0 }
 0x2bd   :  { %v1457_v40 = vadd.f32 %v1737_v35, %v1650_v38 }
 0x2be   :  { %v1739_v34 = vpop.f32.mrf.mxu0 }
 0x2d9   :  { %v1496_v36 = vpop.f32.mrf.mxu1 }
 0x2da   :  { %v1497_v37 = vadd.f32 %v1496_v36, %v1457_v40 }
 0x2db   :  { %v1768_v41 = vpop.f32.mrf.mxu1 }
 0x2dc   :  { %1985 = vtanh.f32 %v1497_v37 }
 0x2dd   :  { %v1499_v43 = vpop.f32.mrf.mxu1 }
 0x2df   :  { %v1769_v44 = vpop.f32.mrf.mxu1 }
 0x2e9   :  { %v1986_v45 = vpop.eup %1985 }
 0x2ea   :  { %v1503_v46 = vmul.f32 2.0, %v1986_v45 }
 0x2ec   :  { %1504 = vst [vmem:[#allocation11] sm:$0xff] %v1503_v46 }
 0x2ed   :  { %2098 = shalt.err (!%p2095_p1)
}
 0x2ee   :  { %1514 = dma.vmem_to_hbm [thread:$0]  %s1512_s8, 128, %s2227_s7, [#allocation4]  }
 0x2ef   :  { %2113 = dma.done.wait [#allocation4], 128  }
 0x2f0   :  { %2114 = vsyncadd [#allocation4], 4294967168 }
 0x2f1   :  { %1518 = vsyncpa [#allocation3], 1 }
 0x2f2   :  { %1519 = vsyncpa [#allocation6], 1 }
 0x2f3   :  { %1520 = vsyncpa [#allocation9], 1 }
 0x2f4   :  { %1521 = vsyncpa [#allocation4], 1 }

</bundles_post_ra>
